<compile_context>
chip_gen: v7x
topology: tpu7x:2x2x1
jax: 0.10.0
libtpu: 0.0.40
codegen_flags: <defaults>
</compile_context>

<pallas_src>
import jax
import jax.numpy as jnp
from jax.experimental import pallas as pl
from jax.experimental.pallas import tpu as pltpu


def encoder_kernel(
    img_ref,      # (TB, 784)  f32   image tile (cast to bf16 in-kernel)
    lbl_ref,      # (TB, 1)    i32   labels
    w_h_img_ref,  # (784, 128) bf16  image part of fc_hidden weight (resident)
    lbl_tab_ref,  # (10, 128)  f32   relu(W_emb + b_emb) @ W_h_emb + b_h (per-class)
    w_heads_ref,  # (128, 2L)  f32   [W_mu | W_logvar] (resident)
    b_heads_ref,  # (1, 2L)    f32   [b_mu | b_logvar]
    out_ref,      # (TB, 2L)   f32   [mu | logvar]
):
    tb = img_ref.shape[0]
    num_classes = lbl_tab_ref.shape[0]

    # one-hot(label) @ precomputed label->hidden table (includes b_h):
    # a single tiny K=10 matmul produces the full label + bias contribution.
    classes = jax.lax.broadcasted_iota(jnp.int32, (tb, num_classes), 1)
    one_hot = (classes == lbl_ref[...]).astype(jnp.float32)
    lbl_contrib = jnp.dot(
        one_hot, lbl_tab_ref[...], preferred_element_type=jnp.float32
    )

    # hidden = relu(img @ W_h_img + lbl_contrib); bf16 MXU operands, f32 acc.
    # The cast is a VPU op inside the kernel -> no extra HBM pass.
    img_bf16 = img_ref[...].astype(jnp.bfloat16)
    hidden = (
        jnp.dot(img_bf16, w_h_img_ref[...], preferred_element_type=jnp.float32)
        + lbl_contrib
    )
    hidden = jnp.maximum(hidden, 0.0)

    # fused mu|logvar head: one (TB,128)@(128,2L) matmul, one store.
    out_ref[...] = (
        jnp.dot(hidden, w_heads_ref[...], preferred_element_type=jnp.float32)
        + b_heads_ref[...]
    )


def init_params(key, latent_dim=3, num_classes=10):
    """Deterministic synthetic params, stored as (in, out) matrices."""
    ks = jax.random.split(key, 8)

    def lin(kw, kb, fan_in, fan_out):
        bound = 1.0 / jnp.sqrt(fan_in)
        w = jax.random.uniform(kw, (fan_in, fan_out), jnp.float32, -bound, bound)
        b = jax.random.uniform(kb, (1, fan_out), jnp.float32, -bound, bound)
        return w, b

    w_emb, b_emb = lin(ks[0], ks[1], num_classes, 16)
    w_h,   b_h   = lin(ks[2], ks[3], 28 * 28 + 16, 128)
    w_mu,  b_mu  = lin(ks[4], ks[5], 128, latent_dim)
    w_lv,  b_lv  = lin(ks[6], ks[7], 128, latent_dim)
    return {
        "w_emb": w_emb, "b_emb": b_emb,
        "w_h_img": w_h[: 28 * 28], "w_h_emb": w_h[28 * 28:], "b_h": b_h,
        "w_mu": w_mu, "b_mu": b_mu,
        "w_lv": w_lv, "b_lv": b_lv,
    }


def _choose_batch_tile(B, block_b):
    """Batch tile selection.

    - No host-side padding: Pallas handles a ragged last block (OOB writes are
      dropped; padded rows are row-independent garbage that never gets stored).
    - Keeps >= 2 grid steps when the batch is big enough so the "parallel"
      batch axis can be sharded across v7x's two TensorCores.
    - Tile is a multiple of 8 (f32 sublane) unless it equals the full batch.
    """
    if B <= 16:
        return B                              # single block == full array dim
    target = min(block_b, (B + 1) // 2)       # at least 2 grid steps
    return max(8, (target // 8) * 8)          # multiple of 8


def encoder_forward(image_nchw, label, params, latent_dim=3, block_b=2048):
    """image_nchw: (B, 1, 28, 28) f32 ; label: (B,) int32  ->  (mu, logvar)."""
    B = image_nchw.shape[0]
    L = latent_dim
    D_IMG = 28 * 28
    H = 128
    NUM_CLASSES = params["w_emb"].shape[0]

    img_flat = image_nchw.reshape(B, -1).astype(jnp.float32)       # (B, 784) f32
    lbl2d = label.astype(jnp.int32).reshape(B, 1)                  # (B, 1)

    # --- host-side pre-fusions -------------------------------------------
    # Per-class hidden contribution (absorbs fc_hidden bias as well):
    #   relu(eye(C) @ W_emb + b_emb) @ W_h_emb + b_h
    lbl_tab = (
        jax.nn.relu(params["w_emb"] + params["b_emb"]) @ params["w_h_emb"]
        + params["b_h"]
    ).astype(jnp.float32)                                          # (10, 128)
    # Fused mu|logvar head.
    w_heads = jnp.concatenate([params["w_mu"], params["w_lv"]], axis=1)  # (128, 2L)
    b_heads = jnp.concatenate([params["b_mu"], params["b_lv"]], axis=1)  # (1, 2L)
    # Weight for the dominant matmul stays resident in VMEM as bf16 (~200 KiB).
    w_h_img_bf16 = params["w_h_img"].astype(jnp.bfloat16)

    # --- batch tiling (no padded copy of the image) -----------------------
    TB = _choose_batch_tile(B, block_b)
    grid = (pl.cdiv(B, TB),)

    cost = pl.CostEstimate(
        flops=2 * B * (D_IMG * H + NUM_CLASSES * H + H * 2 * L),
        transcendentals=0,
        bytes_accessed=(
            B * (D_IMG * 4 + 4 + 2 * L * 4)           # image + labels + output
            + D_IMG * H * 2                            # bf16 fc_hidden weight
            + (NUM_CLASSES * H + H * 2 * L + 2 * L) * 4
        ),
    )

    out = pl.pallas_call(
        encoder_kernel,
        out_shape=jax.ShapeDtypeStruct((B, 2 * L), jnp.float32),
        grid=grid,
        in_specs=[
            pl.BlockSpec((TB, D_IMG), lambda i: (i, 0)),           # image tile
            pl.BlockSpec((TB, 1), lambda i: (i, 0)),               # labels
            pl.BlockSpec((D_IMG, H), lambda i: (0, 0)),            # W_h_img (resident)
            pl.BlockSpec((NUM_CLASSES, H), lambda i: (0, 0)),      # label table (+b_h)
            pl.BlockSpec((H, 2 * L), lambda i: (0, 0)),            # fused head W
            pl.BlockSpec((1, 2 * L), lambda i: (0, 0)),            # fused head b
        ],
        out_specs=pl.BlockSpec((TB, 2 * L), lambda i: (i, 0)),
        compiler_params=pltpu.CompilerParams(
            dimension_semantics=("parallel",),
            vmem_limit_bytes=32 * 1024 * 1024,
        ),
        cost_estimate=cost,
    )(img_flat, lbl2d, w_h_img_bf16, lbl_tab, w_heads, b_heads)

    return out[:, :L], out[:, L:]


def encoder_forward_ref(image_nchw, label, params):
    """Pure-JAX f32 reference mirroring the PyTorch forward."""
    B = image_nchw.shape[0]
    img = image_nchw.reshape(B, -1).astype(jnp.float32)
    one_hot = jax.nn.one_hot(label, 10, dtype=jnp.float32)
    emb = jax.nn.relu(one_hot @ params["w_emb"] + params["b_emb"])
    cat = jnp.concatenate([img, emb], axis=1)
    w_h = jnp.concatenate([params["w_h_img"], params["w_h_emb"]], axis=0)
    hidden = jax.nn.relu(cat @ w_h + params["b_h"])
    mu = hidden @ params["w_mu"] + params["b_mu"]
    logvar = hidden @ params["w_lv"] + params["b_lv"]
    return mu, logvar


if __name__ == "__main__":
    key = jax.random.PRNGKey(0)
    k_img, k_lbl, k_par = jax.random.split(key, 3)

    B, latent_dim, num_classes = 2, 3, 10
    image = jax.random.normal(k_img, (B, 1, 28, 28), dtype=jnp.float32)
    label = jax.random.randint(k_lbl, (B,), 0, num_classes, dtype=jnp.int32)
    params = init_params(k_par, latent_dim=latent_dim, num_classes=num_classes)

    mu, logvar = encoder_forward(image, label, params, latent_dim=latent_dim)
    jax.block_until_ready((mu, logvar))

    mu_ref, logvar_ref = encoder_forward_ref(image, label, params)
    assert mu.shape == (B, latent_dim) and logvar.shape == (B, latent_dim)
    # bf16 operands on the K=784 matmul -> relaxed tolerance vs. the f32 reference.
    assert jnp.allclose(mu, mu_ref, atol=3e-2, rtol=3e-2), (mu, mu_ref)
    assert jnp.allclose(logvar, logvar_ref, atol=3e-2, rtol=3e-2), (logvar, logvar_ref)

    print("KERNEL_OK")
</pallas_src>

<mosaic_0001>
module attributes {stable_mosaic.version = 11 : i64} {
  func.func @encoder_kernel(%arg0: i32, %arg1: memref<2x784xf32, #tpu.memory_space<vmem>>, %arg2: memref<2x1xi32, #tpu.memory_space<vmem>>, %arg3: memref<784x128xbf16, #tpu.memory_space<vmem>>, %arg4: memref<10x128xf32, #tpu.memory_space<vmem>>, %arg5: memref<128x6xf32, #tpu.memory_space<vmem>>, %arg6: memref<1x6xf32, #tpu.memory_space<vmem>>, %arg7: memref<2x6xf32, #tpu.memory_space<vmem>>) attributes {dimension_semantics = [#tpu.dimension_semantics<parallel>], iteration_bounds = array<i64: 1>, scalar_prefetch = 0 : i64, scratch_operands = 0 : i64, tpu.core_type = #tpu.core_type<tc>, window_params = [{transform_indices = @transform_0, window_bounds = array<i64: 2, 784>}, {transform_indices = @transform_1, window_bounds = array<i64: 2, 1>}, {pipeline_mode = #tpu.pipeline_mode<synchronous>, transform_indices = @transform_2, window_bounds = array<i64: 784, 128>}, {pipeline_mode = #tpu.pipeline_mode<synchronous>, transform_indices = @transform_3, window_bounds = array<i64: 10, 128>}, {pipeline_mode = #tpu.pipeline_mode<synchronous>, transform_indices = @transform_4, window_bounds = array<i64: 128, 6>}, {pipeline_mode = #tpu.pipeline_mode<synchronous>, transform_indices = @transform_5, window_bounds = array<i64: 1, 6>}, {transform_indices = @transform_6, window_bounds = array<i64: 2, 6>}]} {
    %0 = tpu.iota {dimensions = array<i32: 1>} : vector<2x10xi32>
    %c0 = arith.constant 0 : index
    %c0_0 = arith.constant 0 : index
    %1 = vector.load %arg2[%c0, %c0_0] : memref<2x1xi32, #tpu.memory_space<vmem>>, vector<2x1xi32>
    %2 = vector.broadcast %1 : vector<2x1xi32> to vector<2x10xi32>
    %3 = arith.cmpi eq, %0, %2 : vector<2x10xi32>
    %4 = arith.extui %3 : vector<2x10xi1> to vector<2x10xi32>
    %5 = arith.sitofp %4 : vector<2x10xi32> to vector<2x10xf32>
    %c0_1 = arith.constant 0 : index
    %c0_2 = arith.constant 0 : index
    %6 = vector.load %arg4[%c0_1, %c0_2] : memref<10x128xf32, #tpu.memory_space<vmem>>, vector<10x128xf32>
    %cst = arith.constant dense<0.000000e+00> : vector<2x128xf32>
    %7 = tpu.matmul %5, %6, %cst {dimension_numbers = #tpu.dot_dimension_numbers<[1], [0], [0], [1], [0, 0, 1, 1], [], []>} : vector<2x10xf32>, vector<10x128xf32>, vector<2x128xf32> -> vector<2x128xf32>
    %c0_3 = arith.constant 0 : index
    %c0_4 = arith.constant 0 : index
    %8 = vector.load %arg1[%c0_3, %c0_4] : memref<2x784xf32, #tpu.memory_space<vmem>>, vector<2x784xf32>
    %9 = arith.truncf %8 : vector<2x784xf32> to vector<2x784xbf16>
    %c0_5 = arith.constant 0 : index
    %c0_6 = arith.constant 0 : index
    %10 = vector.load %arg3[%c0_5, %c0_6] : memref<784x128xbf16, #tpu.memory_space<vmem>>, vector<784x128xbf16>
    %cst_7 = arith.constant dense<0.000000e+00> : vector<2x128xf32>
    %11 = tpu.matmul %9, %10, %cst_7 {dimension_numbers = #tpu.dot_dimension_numbers<[1], [0], [0], [1], [0, 0, 1, 1], [], []>} : vector<2x784xbf16>, vector<784x128xbf16>, vector<2x128xf32> -> vector<2x128xf32>
    %12 = arith.addf %11, %7 : vector<2x128xf32>
    %cst_8 = arith.constant 0.000000e+00 : f32
    %13 = vector.broadcast %cst_8 : f32 to vector<2x128xf32>
    %14 = arith.maximumf %12, %13 : vector<2x128xf32>
    %c0_9 = arith.constant 0 : index
    %c0_10 = arith.constant 0 : index
    %15 = vector.load %arg5[%c0_9, %c0_10] : memref<128x6xf32, #tpu.memory_space<vmem>>, vector<128x6xf32>
    %cst_11 = arith.constant dense<0.000000e+00> : vector<2x6xf32>
    %16 = tpu.matmul %14, %15, %cst_11 {dimension_numbers = #tpu.dot_dimension_numbers<[1], [0], [0], [1], [0, 0, 1, 1], [], []>} : vector<2x128xf32>, vector<128x6xf32>, vector<2x6xf32> -> vector<2x6xf32>
    %c0_12 = arith.constant 0 : index
    %c0_13 = arith.constant 0 : index
    %17 = vector.load %arg6[%c0_12, %c0_13] : memref<1x6xf32, #tpu.memory_space<vmem>>, vector<1x6xf32>
    %18 = vector.broadcast %17 : vector<1x6xf32> to vector<2x6xf32>
    %19 = arith.addf %16, %18 : vector<2x6xf32>
    %c0_14 = arith.constant 0 : index
    %c0_15 = arith.constant 0 : index
    %20 = vector.load %arg7[%c0_14, %c0_15] : memref<2x6xf32, #tpu.memory_space<vmem>>, vector<2x6xf32>
    tpu.vector_store %arg7[%c0_14, %c0_15], %19 {strides = array<i32>} : memref<2x6xf32, #tpu.memory_space<vmem>>, vector<2x6xf32>,
    return
  }
  func.func @transform_0(%arg0: i32) -> (i32, i32) {
    %c0_i32 = arith.constant 0 : i32
    %c0_i32_0 = arith.constant 0 : i32
    return %arg0, %c0_i32 : i32, i32
  }
  func.func @transform_1(%arg0: i32) -> (i32, i32) {
    %c0_i32 = arith.constant 0 : i32
    %c0_i32_0 = arith.constant 0 : i32
    return %arg0, %c0_i32 : i32, i32
  }
  func.func @transform_2(%arg0: i32) -> (i32, i32) {
    %c0_i32 = arith.constant 0 : i32
    %c0_i32_0 = arith.constant 0 : i32
    %c0_i32_1 = arith.constant 0 : i32
    return %c0_i32, %c0_i32_0 : i32, i32
  }
  func.func @transform_3(%arg0: i32) -> (i32, i32) {
    %c0_i32 = arith.constant 0 : i32
    %c0_i32_0 = arith.constant 0 : i32
    %c0_i32_1 = arith.constant 0 : i32
    return %c0_i32, %c0_i32_0 : i32, i32
  }
  func.func @transform_4(%arg0: i32) -> (i32, i32) {
    %c0_i32 = arith.constant 0 : i32
    %c0_i32_0 = arith.constant 0 : i32
    %c0_i32_1 = arith.constant 0 : i32
    return %c0_i32, %c0_i32_0 : i32, i32
  }
  func.func @transform_5(%arg0: i32) -> (i32, i32) {
    %c0_i32 = arith.constant 0 : i32
    %c0_i32_0 = arith.constant 0 : i32
    %c0_i32_1 = arith.constant 0 : i32
    return %c0_i32, %c0_i32_0 : i32, i32
  }
  func.func @transform_6(%arg0: i32) -> (i32, i32) {
    %c0_i32 = arith.constant 0 : i32
    %c0_i32_0 = arith.constant 0 : i32
    return %arg0, %c0_i32 : i32, i32
  }
}

</mosaic_0001>

<bundles_post_ra>
// kernel: tpu_custom_call.1
= control target key start
LH: loop header
LB: loop body
LE: loop exit
PB: predicated region body
PF: predicated region fallthrough
CT: control target
= control target key end

     0   :  { %11 = vsyncpa [#allocation3], 0  ;;  %s1338_s0 = inlined_call_operand.vmem [shape: f32[2,784], index: 0, kind: input, shape index: {}]   ;;  %s1339_s1 = inlined_call_operand.vmem [shape: s32[2,1], index: 1, kind: input, shape index: {}]   ;;  %s1340_s2 = inlined_call_operand.hbm [shape: bf16[784,128], index: 2, kind: input, shape index: {}]   ;;  %s1341_s3 = inlined_call_operand.vmem [shape: f32[10,128], index: 3, kind: input, shape index: {}]   ;;  %s1342_s4 = inlined_call_operand.vmem [shape: f32[128,6], index: 4, kind: input, shape index: {}]   ;;  %s1343_s5 = inlined_call_operand.vmem [shape: f32[1,6], index: 5, kind: input, shape index: {}]   ;;  %s1344_s6 = inlined_call_operand.hbm [shape: f32[2,6], index: 6, kind: output, shape index: {}]  }
   0x1   :  { %12 = vsyncpa [#allocation4], 0  ;;  %s1174_s21 = smov [#allocation2]   ;;  %s1126_s25 = scalar_lea.hbm %s1340_s2, 6272 }
   0x2   :  { %s22_s22 = sshll.u32 %s1174_s21, 4  ;;  %p1127_p0 = scmp.ne.s32.totalorder %s1340_s2, %s1126_s25  ;;  %s23_s22 = int_to_ptr.vmem [resolvable:$true] %s22_s22 }
   0x3   :  { %p1130_p1 = scmp.lt.u32.totalorder %s1126_s25, %s1340_s2 }
   0x5   :  { %p1132_p2 = pnand %p1130_p1, %p1127_p0 }
   0x7   :  { %1135 = shalt.err (!%p1132_p2)
}
   0x8   :  { %s1136_s30 = scalar_lea.vmem %s23_s22, 6272  ;;  %p1141_p4 = scmp.lt.s32.totalorder %s23_s22, %s23_s22 }
   0x9   :  { %p1137_p3 = scmp.ne.s32.totalorder %s23_s22, %s1136_s30  ;;  %p1142_p5 = scmp.lt.s32.totalorder %s1136_s30, %s1136_s30 }
   0xb   :  { %p1143_p6 = por %p1142_p5, %p1141_p4 }
   0xd   :  { %p1144_p7 = pnand %p1143_p6, %p1137_p3 }
   0xf   :  { %1147 = shalt.err (!%p1144_p7)
}
  0x10   :  { %s1175_s7 = smov 64   ;;  %s1176_s8 = smov 4  }
  0x11   :  { %28 = dma.hbm_to_vmem [thread:$0]  %s1340_s2, 6272, %s23_s22, [#allocation3], %s1175_s7, %s1175_s7, %s1176_s8  }
  0x12   :  { %1170 = dma.done.wait [#allocation3], 6272  }
  0x13   :  { %1171 = vsyncadd [#allocation3], 4294961024  ;;  %v1177_v0 = vmov 0   ;;  %v1178_v1 = vmov 0.0|0.0   ;;  %vm54_vm0 = vcmask 1041408   ;;  %vm1179_vm1 = vmmov 1  }
  0x14   :  { %1074 = vset.pattern.permute.xlu0 %v1177_v0  ;;  %1036 = vmatprep.subr.bf16.mxu1 %v1178_v1  ;;  %vm1038_vm2 = vmpackc.low %vm54_vm0, %vm1179_vm1  ;;  %v41_v2 = vld [vmem:[%s1339_s1] sm:$0x3]  ;;  %v49_v4 = vld [vmem:[%s1341_s3 + $0x8] sm:$0x3]  ;;  %vm1180_vm3 = vmmov 0   ;;  %v1181_v7 = vmov 0.0   ;;  %v39_v20 = vlaneseq }
  0x15   :  { %v48_v3 = vld [vmem:[%s1341_s3] sm:$0xff]  ;;  %43 = vperm.xlu0 %1074, %v41_v2   ;;  %992 = vmatprep.mubr.msk.f32.mxu1 %vm1180_vm3, %v1181_v7  ;;  %v1081_v10 = vld [vmem:[#allocation2 + $0xc8] sm:$0xff]   ;;  %v1085_v12 = vld [vmem:[#allocation2 + $0xd0] sm:$0xff]   ;;  %v1182_v18 = vmov 1983009808   ;;  %vm571_vm4 = vcmask 130048  }
  0x16   :  { %v1037_v5 = vpack.c.bf16 %v49_v4, %v48_v3  ;;  %v1075_v6 = vld [vmem:[#allocation2 + $0x40] sm:$0xff]   ;;  %v1082_v11 = vld [vmem:[#allocation2 + $0x88] sm:$0xff]   ;;  %v1086_v13 = vld [vmem:[#allocation2 + $0x90] sm:$0xff]   ;;  %v134_v19 = vunpack.c.l.s4 %v1182_v18  ;;  %v137_v24 = vshrl.u32 %v39_v20, 7  ;;  %v40_v44 = vand.u32 127, %v39_v20  ;;  %s1183_s22 = smov [#allocation5]  }
  0x17   :  { %v1077_v8 = vld [vmem:[#allocation2 + $0xc0] sm:$0xff]   ;;  %v1089_v14 = vld [vmem:[#allocation2 + $0xd8] sm:$0xff]   ;;  %v1097_v21 = vld [vmem:[#allocation2 + $0xe8] sm:$0xff]   ;;  %vm50_vm5 = vcmask 80896   ;;  %s837_s23 = sshll.u32 %s1183_s22, 4  ;;  %vm829_vm7 = vcmask 41984   ;;  %s838_s23 = int_to_ptr.vmem [resolvable:$true] %s837_s23 }
  0x18   :  { %1039 = vmatpush3.bf16.msk.msra.mxu1 %vm1038_vm2, %v1037_v5  ;;  %v1078_v9 = vld [vmem:[#allocation2 + $0x80] sm:$0xff]   ;;  %925 = vmatprep.subr.bf16.mxu0 %v1077_v8  ;;  %v1090_v15 = vld [vmem:[#allocation2 + $0x98] sm:$0xff]   ;;  %v1098_v22 = vld [vmem:[#allocation2 + $0xa8] sm:$0xff]   ;;  %v135_v23 = vunpack.c.0.s8 %v134_v19  ;;  %s1148_s24 = scalar_lea.vmem %s838_s23, 32  ;;  %p1153_p9 = scmp.lt.s32.totalorder %s838_s23, %s838_s23 }
  0x19   :  { %903 = vmatprep.subr.bf16.mxu1 %v1075_v6  ;;  %926 = vmatpush3.bf16.msra.mxu0 %v1078_v9  ;;  %v1093_v16 = vld [vmem:[#allocation2 + $0xe0] sm:$0xff]   ;;  %v1101_v25 = vld [vmem:[#allocation2 + $0xf0] sm:$0xff]   ;;  %v1105_v28 = vld [vmem:[#allocation2 + $0xf8] sm:$0xff]   ;;  %p1149_p8 = scmp.ne.s32.totalorder %s838_s23, %s1148_s24  ;;  %p1154_p10 = scmp.lt.s32.totalorder %s1148_s24, %s1148_s24 }
  0x1a   :  { %927 = vmatprep.subr.bf16.mxu0 %v1081_v10  ;;  %v1094_v17 = vld [vmem:[#allocation2 + $0xa0] sm:$0xff]   ;;  %v1102_v26 = vld [vmem:[#allocation2 + $0xb0] sm:$0xff]   ;;  %v138_v27 = vsub.s32 %v135_v23, %v137_v24  ;;  %v1106_v31 = vld [vmem:[#allocation2 + $0xb8] sm:$0xff]  }
  0x1b   :  { %v128_v29 = vld [vmem:[%s1338_s0] sm:$0xff]  ;;  %v129_v37 = vld [vmem:[%s1338_s0 + $0x8] sm:$0x3f]  ;;  %v1083_v51 = vld [vmem:[#allocation2 + $0x50] sm:$0xff]   ;;  %p1155_p11 = por %p1154_p10, %p1153_p9 }
  0x1c   :  { %v1246_v30 = vrot.slane %v128_v29, %v138_v27  ;;  %v132_v32 = vcombine.high %v128_v29, %v128_v29  ;;  %v1254_v38 = vrot.slane %v129_v37, %v138_v27  ;;  %v149_v39 = vcombine.high %v129_v37, %v129_v37  ;;  %v1124_v40 = vld [vmem:[#allocation2 + $0x180] sm:$0xff]   ;;  %v1079_v48 = vld [vmem:[#allocation2 + $0x48] sm:$0xff]   ;;  %v1084_v52 = vld [vmem:[#allocation2 + $0x10] sm:$0xff]  }
  0x1d   :  { %928 = vmatpush3.bf16.msra.mxu0 %v1082_v11  ;;  %v1076_v46 = vld [vmem:[#allocation2] sm:$0xff]   ;;  %v1080_v50 = vld [vmem:[#allocation2 + $0x8] sm:$0xff]   ;;  %v1087_v53 = vld [vmem:[#allocation2 + $0x58] sm:$0xff]   ;;  %p1156_p12 = pnand %p1155_p11, %p1149_p8 }
  0x1e   :  { %929 = vmatprep.subr.bf16.mxu0 %v1085_v12  ;;  %v146_v33 = vrot.slane %v132_v32, %v138_v27  ;;  %v163_v41 = vrot.slane %v149_v39, %v138_v27  ;;  %v147_v43 = vcombine.high %v1246_v30, %v1246_v30  ;;  %v1088_v54 = vld [vmem:[#allocation2 + $0x18] sm:$0xff]   ;;  %v1091_v55 = vld [vmem:[#allocation2 + $0x60] sm:$0xff]   ;;  %v1095_v57 = vld [vmem:[#allocation2 + $0x68] sm:$0xff]   ;;  %v164_v63 = vcombine.high %v1254_v38, %v1254_v38 }
  0x1f   :  { %v1092_v56 = vld [vmem:[#allocation2 + $0x20] sm:$0xff]   ;;  %v1096_v58 = vld [vmem:[#allocation2 + $0x28] sm:$0xff]   ;;  %v1099_v59 = vld [vmem:[#allocation2 + $0x70] sm:$0xff]   ;;  %v172_v2 = vpack.c.bf16 %v1246_v30, %v1246_v30  ;;  %v176_v19 = vpack.c.bf16 %v1254_v38, %v1254_v38 }
  0x20   :  { %v148_v34 = vcombine.high %v146_v33, %v146_v33  ;;  %v174_v35 = vpack.c.bf16 %v146_v33, %v146_v33  ;;  %v178_v42 = vpack.c.bf16 %v163_v41, %v163_v41  ;;  %v173_v47 = vpack.c.bf16 %v147_v43, %v147_v43  ;;  %v1100_v60 = vld [vmem:[#allocation2 + $0x30] sm:$0xff]   ;;  %v1103_v61 = vld [vmem:[#allocation2 + $0x78] sm:$0xff]   ;;  %v1107_v0 = vld [vmem:[#allocation2 + $0x140] sm:$0xff]  }
  0x21   :  { %930 = vmatpush3.bf16.msra.mxu0 %v1086_v13  ;;  %v1104_v62 = vld [vmem:[#allocation2 + $0x38] sm:$0xff]   ;;  %v1109_v3 = vld [vmem:[#allocation2 + $0x100] sm:$0xff]   ;;  %v177_v4 = vpack.c.bf16 %v164_v63, %v164_v63  ;;  %v1110_v5 = vld [vmem:[#allocation2 + $0x148] sm:$0xff]  }
  0x22   :  { %931 = vmatprep.subr.bf16.mxu0 %v1089_v14  ;;  %v175_v36 = vpack.c.bf16 %v148_v34, %v148_v34  ;;  %v1111_v6 = vld [vmem:[#allocation2 + $0x108] sm:$0xff]   ;;  %v1113_v8 = vld [vmem:[#allocation2 + $0x110] sm:$0xff]   ;;  %v1114_v9 = vld [vmem:[#allocation2 + $0x158] sm:$0xff]  }
  0x23   :  { %v1115_v10 = vld [vmem:[#allocation2 + $0x118] sm:$0xff]   ;;  %v1116_v11 = vld [vmem:[#allocation2 + $0x160] sm:$0xff]   ;;  %v1118_v13 = vld [vmem:[#allocation2 + $0x168] sm:$0xff]  }
  0x24   :  { %647 = vmatprep.mubr.bf16.mxu0 %v175_v36  ;;  %v1117_v12 = vld [vmem:[#allocation2 + $0x120] sm:$0xff]   ;;  %v1119_v14 = vld [vmem:[#allocation2 + $0x128] sm:$0xff]   ;;  %v1123_v18 = vld [vmem:[#allocation2 + $0x138] sm:$0xff]  }
  0x25   :  { %932 = vmatpush3.bf16.msra.mxu0 %v1090_v15  ;;  %v1120_v15 = vld [vmem:[#allocation2 + $0x170] sm:$0xff]   ;;  %v736_v20 = vld [vmem:[%s1342_s4] sm:$0xff]  ;;  %v745_v38 = vld [vmem:[%s1342_s4 + $0x48] sm:$0xff] }
  0x26   :  { %933 = vmatprep.subr.bf16.mxu0 %v1093_v16  ;;  %v1121_v16 = vld [vmem:[#allocation2 + $0x130] sm:$0xff]   ;;  %v740_v30 = vld [vmem:[%s1342_s4 + $0x20] sm:$0xff]  ;;  %v747_v41 = vld [vmem:[%s1342_s4 + $0x58] sm:$0xff] }
  0x27   :  { %v742_v34 = vld [vmem:[%s1342_s4 + $0x30] sm:$0xff]  ;;  %v744_v37 = vld [vmem:[%s1342_s4 + $0x40] sm:$0xff] }
  0x28   :  { %v1053_v39 = vpack.c.bf16 %v745_v38, %v744_v37  ;;  %v748_v43 = vld [vmem:[%s1342_s4 + $0x60] sm:$0xff] }
  0x29   :  { %934 = vmatpush3.bf16.msra.mxu0 %v1094_v17  ;;  %v1122_v17 = vld [vmem:[#allocation2 + $0x178] sm:$0xff]  }
  0x2a   :  { %935 = vmatprep.subr.bf16.mxu0 %v1097_v21  ;;  %v737_v21 = vld [vmem:[%s1342_s4 + $0x8] sm:$0xff] }
  0x2b   :  { %v1041_v24 = vpack.c.bf16 %v737_v21, %v736_v20 }
  0x2d   :  { %936 = vmatpush3.bf16.msra.mxu0 %v1098_v22  ;;  %v738_v22 = vld [vmem:[%s1342_s4 + $0x10] sm:$0xff] }
  0x2e   :  { %937 = vmatprep.subr.bf16.mxu0 %v1101_v25  ;;  %v739_v25 = vld [vmem:[%s1342_s4 + $0x18] sm:$0xff] }
  0x31   :  { %938 = vmatpush3.bf16.msra.mxu0 %v1102_v26 }
  0x32   :  { %939 = vmatprep.subr.bf16.mxu0 %v1105_v28  ;;  %v1044_v28 = vpack.c.bf16 %v739_v25, %v738_v22 }
  0x35   :  { %940 = vmatpush3.bf16.msra.mxu0 %v1106_v31  ;;  %v741_v31 = vld [vmem:[%s1342_s4 + $0x28] sm:$0xff] }
  0x36   :  { %995 = vmatprep.subr.bf16.mxu0 %v1181_v7  ;;  %v1047_v33 = vpack.c.bf16 %v741_v31, %v740_v30 }
  0x38   :  { %648 = vmatmul.mubr.bf16.vlgmr.msra.gmra.mrb[0].mxu0 %v174_v35  ;;  %v743_v35 = vld [vmem:[%s1342_s4 + $0x38] sm:$0xff] }
  0x39   :  { %997 = vmatprep.mubr.msk.bf16.mxu0 %vm1180_vm3, %v1181_v7  ;;  %996 = vmatpush3.bf16.msra.mxu0 %v1124_v40  ;;  %v1050_v36 = vpack.c.bf16 %v743_v35, %v742_v34  ;;  %v746_v40 = vld [vmem:[%s1342_s4 + $0x50] sm:$0xff] }
  0x3a   :  { %1040 = vmatprep.subr.bf16.mxu0 %v1178_v1 }
  0x40   :  { %998 = vmatmul.mubr.msk.bf16.vlgmr.msra.gmra.mrb[4].mxu0 %vm571_vm4, %v178_v42  ;;  %v1056_v42 = vpack.c.bf16 %v747_v41, %v746_v40 }
  0x41   :  { %1033 = vmatprep.mubr.msk.f32.mxu0 %vm1180_vm3, %v1181_v7  ;;  %1042 = vmatpush3.bf16.msra.mxu0 %v1041_v24 }
  0x42   :  { %1043 = vmatprep.subr.bf16.mxu0 %v1178_v1 }
  0x45   :  { %1045 = vmatpush3.bf16.msra.mxu0 %v1044_v28 }
  0x46   :  { %1046 = vmatprep.subr.bf16.mxu0 %v1178_v1 }
  0x49   :  { %1048 = vmatpush3.bf16.msra.mxu0 %v1047_v33 }
  0x4a   :  { %1049 = vmatprep.subr.bf16.mxu0 %v1178_v1 }
  0x4d   :  { %1051 = vmatpush3.bf16.msra.mxu0 %v1050_v36 }
  0x4e   :  { %1052 = vmatprep.subr.bf16.mxu0 %v1178_v1 }
  0x51   :  { %1054 = vmatpush3.bf16.msra.mxu0 %v1053_v39 }
  0x52   :  { %1055 = vmatprep.subr.bf16.mxu0 %v1178_v1 }
  0x55   :  { %1057 = vmatpush3.bf16.msra.mxu0 %v1056_v42 }
  0x56   :  { %1058 = vmatprep.subr.bf16.mxu0 %v1178_v1 }
  0x94   :  { %v44_v45 = vpop.permute.xlu0 %43 }
  0x95   :  { %vm45_vm6 = vcmp.eq.s32.totalorder %v40_v44, %v44_v45  ;;  %v749_v44 = vld [vmem:[%s1342_s4 + $0x68] sm:$0xff] }
  0x96   :  { %v846_v49 = vsel %vm45_vm6, 1.0, %v1181_v7  ;;  %v1112_v7 = vld [vmem:[#allocation2 + $0x150] sm:$0xff]   ;;  %v1059_v45 = vpack.c.bf16 %v749_v44, %v748_v43 }
  0x97   :  { %993 = vmatmul.mubr.msk.f32.vlgmr.msra.gmra.mrb[0].mxu1 %vm50_vm5, %v846_v49  ;;  %v750_v49 = vld [vmem:[%s1342_s4 + $0x70] sm:$0xff] }
  0x98   :  { %904 = vmatpush3.bf16.msra.mxu1 %v1076_v46  ;;  %607 = vmatprep.mubr.bf16.mxu1 %v173_v47 }
  0x99   :  { %905 = vmatprep.subr.bf16.mxu1 %v1079_v48  ;;  %1060 = vmatpush3.bf16.msra.mxu0 %v1059_v45 }
  0x9a   :  { %1061 = vmatprep.subr.bf16.mxu0 %v1178_v1 }
  0x9c   :  { %906 = vmatpush3.bf16.msra.mxu1 %v1080_v50  ;;  %v751_v50 = vld [vmem:[%s1342_s4 + $0x78] sm:$0xff] }
  0x9d   :  { %907 = vmatprep.subr.bf16.mxu1 %v1083_v51 }
  0xa0   :  { %908 = vmatpush3.bf16.msra.mxu1 %v1084_v52  ;;  %v1062_v52 = vpack.c.bf16 %v751_v50, %v750_v49 }
  0xa1   :  { %909 = vmatprep.subr.bf16.mxu1 %v1087_v53 }
  0xa2   :  { %1063 = vmatpush3.bf16.msra.mxu0 %v1062_v52 }
  0xa4   :  { %910 = vmatpush3.bf16.msra.mxu1 %v1088_v54 }
  0xa5   :  { %911 = vmatprep.subr.bf16.mxu1 %v1091_v55 }
  0xa8   :  { %912 = vmatpush3.bf16.msra.mxu1 %v1092_v56 }
  0xa9   :  { %913 = vmatprep.subr.bf16.mxu1 %v1095_v57 }
  0xac   :  { %914 = vmatpush3.bf16.msra.mxu1 %v1096_v58 }
  0xad   :  { %915 = vmatprep.subr.bf16.mxu1 %v1099_v59 }
  0xb0   :  { %916 = vmatpush3.bf16.msra.mxu1 %v1100_v60 }
  0xb1   :  { %917 = vmatprep.subr.bf16.mxu1 %v1103_v61 }
  0xb4   :  { %918 = vmatpush3.bf16.msra.mxu1 %v1104_v62 }
  0xb5   :  { %947 = vmatprep.subr.bf16.mxu1 %v1107_v0 }
  0xb7   :  { %608 = vmatmul.mubr.bf16.vlgmr.msra.gmra.mrb[4].mxu1 %v172_v2 }
  0xb8   :  { %948 = vmatpush3.bf16.msra.mxu1 %v1109_v3  ;;  %687 = vmatprep.mubr.bf16.mxu1 %v177_v4 }
  0xb9   :  { %949 = vmatprep.subr.bf16.mxu1 %v1110_v5 }
  0xbc   :  { %950 = vmatpush3.bf16.msra.mxu1 %v1111_v6  ;;  %v899_v6 = vld [vmem:[%s1343_s5] ss:$0 sm:$0xff] }
  0xbd   :  { %951 = vmatprep.subr.bf16.mxu1 %v1112_v7 }
  0xc0   :  { %952 = vmatpush3.bf16.msra.mxu1 %v1113_v8 }
  0xc1   :  { %953 = vmatprep.subr.bf16.mxu1 %v1114_v9 }
  0xc4   :  { %954 = vmatpush3.bf16.msra.mxu1 %v1115_v10 }
  0xc5   :  { %955 = vmatprep.subr.bf16.mxu1 %v1116_v11 }
  0xc8   :  { %956 = vmatpush3.bf16.msra.mxu1 %v1117_v12 }
  0xc9   :  { %957 = vmatprep.subr.bf16.mxu1 %v1118_v13 }
  0xcc   :  { %958 = vmatpush3.bf16.msra.mxu1 %v1119_v14 }
  0xcd   :  { %959 = vmatprep.subr.bf16.mxu1 %v1120_v15 }
  0xd0   :  { %960 = vmatpush3.bf16.msra.mxu1 %v1121_v16 }
  0xd1   :  { %961 = vmatprep.subr.bf16.mxu1 %v1122_v17 }
  0xd4   :  { %962 = vmatpush3.bf16.msra.mxu1 %v1123_v18 }
  0xd7   :  { %688 = vmatmul.mubr.bf16.vlgmr.msra.gmra.mrb[8].mxu1 %v176_v19 }
 0x10b   :  { %v941_v23 = vpop.f32.mrb[0].mxu0 }
 0x10c   :  { %v942_v26 = vpop.f32.mrb[1].mxu0 }
 0x10d   :  { %v943_v27 = vadd.f32 %v942_v26, %v941_v23  ;;  %v944_v29 = vpop.f32.mrb[2].mxu0 }
 0x10e   :  { %v945_v32 = vpop.f32.mrb[3].mxu0 }
 0x113   :  { %v729_v46 = vpop.f32.mrb[4].mxu0 }
 0x114   :  { %v999_v47 = vpop.f32.mrb[5].mxu0 }
 0x115   :  { %v732_v48 = vpop.f32.mrb[6].mxu0 }
 0x116   :  { %v1000_v51 = vpop.f32.mrb[7].mxu0 }
 0x16a   :  { %v124_v53 = vpop.f32.mrb[0].mxu1 }
 0x16b   :  { %v994_v54 = vpop.f32.mrb[1].mxu1 }
 0x18a   :  { %v919_v55 = vpop.f32.mrb[4].mxu1 }
 0x18b   :  { %v920_v56 = vpop.f32.mrb[5].mxu1 }
 0x18c   :  { %v921_v57 = vadd.f32 %v920_v56, %v919_v55  ;;  %v922_v58 = vpop.f32.mrb[6].mxu1 }
 0x18d   :  { %v923_v59 = vpop.f32.mrb[7].mxu1 }
 0x18e   :  { %v610_v60 = vadd.f32 %v921_v57, %v124_v53 }
 0x190   :  { %v650_v1 = vadd.f32 %v943_v27, %v610_v60 }
 0x1aa   :  { %v963_v61 = vpop.f32.mrb[8].mxu1 }
 0x1ab   :  { %v964_v62 = vpop.f32.mrb[9].mxu1 }
 0x1ac   :  { %v965_v63 = vadd.f32 %v964_v62, %v963_v61  ;;  %v966_v0 = vpop.f32.mrb[10].mxu1 }
 0x1ad   :  { %v967_v2 = vpop.f32.mrb[11].mxu1 }
 0x1ae   :  { %v690_v3 = vadd.f32 %v965_v63, %v650_v1 }
 0x1b0   :  { %v730_v4 = vadd.f32 %v729_v46, %v690_v3 }
 0x1b2   :  { %v735_v5 = vmax.f32 %v730_v4, 0.0 }
 0x1b4   :  { %1034 = vmatmul.mubr.f32.vlgmr.msra.gmra.mrb[8].mxu0 %v735_v5 }
 0x287   :  { %v825_v7 = vpop.f32.mrb[8].mxu0 }
 0x288   :  { %v826_v8 = vadd.f32 %v899_v6, %v825_v7  ;;  %v1035_v9 = vpop.f32.mrb[9].mxu0 }
 0x28a   :  { %830 = vst.msk [vmem:[#allocation5] sm:$0x3] %vm829_vm7, %v826_v8 }
 0x28b   :  { %1159 = shalt.err (!%p1156_p12)
}
 0x28c   :  { %s1160_s27 = scalar_lea.hbm %s1344_s6, 32 }
 0x28d   :  { %p1161_p13 = scmp.ne.s32.totalorder %s1344_s6, %s1160_s27  ;;  %p1164_p0 = scmp.lt.u32.totalorder %s1160_s27, %s1344_s6 }
 0x28f   :  { %p1166_p1 = pnand %p1164_p0, %p1161_p13 }
 0x291   :  { %1169 = shalt.err (!%p1166_p1)
}
 0x292   :  { %840 = dma.vmem_to_hbm [thread:$0]  %s838_s23, 32, %s1344_s6, [#allocation4]  }
 0x293   :  { %1172 = dma.done.wait [#allocation4], 32  }
 0x294   :  { %1173 = vsyncadd [#allocation4], 4294967264 }
 0x295   :  { %844 = vsyncpa [#allocation3], 1 }
 0x296   :  { %845 = vsyncpa [#allocation4], 1 }

</bundles_post_ra>
